<compile_context>
chip_gen: v5e
topology: v5e:2x2
jax: 0.10.0
libtpu: 0.0.40
codegen_flags: <defaults>
</compile_context>

<pallas_src>
import functools

import jax
import jax.numpy as jnp
from jax import lax
from jax.experimental import pallas as pl
from jax.experimental.pallas import tpu as pltpu


def _sepconv1d_kernel(x_ref, w_ref, b_ref, o_ref, xp_sc, xcol_sc, *,
                      nb, ci, cip, L, K, pad, lout, relu):
    """Fused Conv1d(stride=1) + bias (+ ReLU) for `nb` batch elements/step.

    x_ref:   (nb, Ci, L)      input block
    w_ref:   (Co, K*Cip)      weights, tap-major along the contraction
    b_ref:   (Co, 1)          bias (broadcast over lanes)
    o_ref:   (nb, Co, Lout)   output block
    xp_sc:   (Cip, L+2*pad)   zero-padded input scratch
    xcol_sc: (K*Cip, Lout)    im2col scratch (sublane-aligned rows)
    """
    pad_needed = (pad > 0) or (cip != ci)
    w2d = w_ref[...]                      # (Co, K*Cip)
    bias = b_ref[...]                     # (Co, 1)

    # Zero once per grid step: only the pad rows/lanes stay zero, the data
    # window is overwritten for every batch element below.
    if pad_needed:
        xp_sc[...] = jnp.zeros_like(xp_sc)

    for b in range(nb):                   # unrolled: amortizes per-step cost
        # ---- fused zero padding (no HBM pad round trip) -------------------
        if pad_needed:
            xp_sc[:ci, pad:pad + L] = x_ref[b]
            xp = xp_sc[...]               # (Cip, Lp)
        else:
            xp = x_ref[b]                 # (Cip, Lp) == (Ci, L)

        # ---- im2col: materialize the K shifted views once -----------------
        # Row (k*Cip + c) of xcol holds xp[c, k : k + Lout]; rows start at
        # multiples of 8 so the stores are sublane-aligned.
        for k in range(K):
            xcol_sc[k * cip:(k + 1) * cip, :] = xp[:, k:k + lout]

        # ---- single MXU matmul with contraction K*Cip ----------------------
        acc = jnp.dot(w2d, xcol_sc[...],
                      preferred_element_type=jnp.float32)   # (Co, Lout)
        acc = acc + bias
        if relu:
            acc = jnp.maximum(acc, 0.0)
        o_ref[b] = acc.astype(o_ref.dtype)


def sepconv1d(x, w, b, *, stride=1, pad=0, relu=True, batch_block=8):
    """SepConv1d forward: Conv1d(ni, no, K, stride, padding=pad) [+ ReLU].

    x: (N, Ci, L) f32;  w: (Co, Ci, K) f32;  b: (Co,) f32  ->  (N, Co, Lout)
    Dropout (if configured on the module) runs in eval mode == identity.
    """
    N, Ci, L = x.shape
    Co, Ci_w, K = w.shape
    assert Ci == Ci_w, (Ci, Ci_w)
    lp = L + 2 * pad
    lout1 = lp - K + 1                      # stride-1 output length
    assert lout1 >= 1, "kernel longer than padded input"

    # Round the channel dim up to a multiple of 8 so the im2col rows are
    # sublane-aligned (padded channels carry zeros in both x and w).
    cip = ((Ci + 7) // 8) * 8
    w_p = jnp.pad(w, ((0, 0), (0, cip - Ci), (0, 0))) if cip != Ci else w
    # (Co, K, Cip) -> (Co, K*Cip): w2d[co, k*Cip + c] == w[co, c, k]
    w2d = jnp.transpose(w_p, (0, 2, 1)).reshape(Co, K * cip)
    b2 = b.reshape(Co, 1)

    # Largest divisor of N that is <= batch_block (keeps blocks exact).
    nb = 1
    for d in range(min(batch_block, N), 0, -1):
        if N % d == 0:
            nb = d
            break

    kernel = functools.partial(
        _sepconv1d_kernel, nb=nb, ci=Ci, cip=cip, L=L, K=K, pad=pad,
        lout=lout1, relu=relu)

    out = pl.pallas_call(
        kernel,
        out_shape=jax.ShapeDtypeStruct((N, Co, lout1), jnp.float32),
        grid_spec=pltpu.PrefetchScalarGridSpec(
            num_scalar_prefetch=0,
            grid=(N // nb,),
            in_specs=[
                pl.BlockSpec((nb, Ci, L), lambda n: (n, 0, 0)),
                pl.BlockSpec((Co, K * cip), lambda n: (0, 0)),
                pl.BlockSpec((Co, 1), lambda n: (0, 0)),
            ],
            out_specs=pl.BlockSpec((nb, Co, lout1), lambda n: (n, 0, 0)),
            scratch_shapes=[
                pltpu.VMEM((cip, lp), jnp.float32),        # padded input
                pltpu.VMEM((K * cip, lout1), jnp.float32),  # im2col block
            ],
        ),
        compiler_params=pltpu.CompilerParams(
            # Batch elements are independent -> shard across TensorCores
            # on megacore parts (v7x); harmless on single-TC v5e/v6e.
            dimension_semantics=("parallel",)),
    )(x, w2d, b2)

    if stride > 1:
        # TODO(synk): fuse the stride into the kernel (strided im2col)
        # instead of downsampling the stride-1 output here.
        out = out[:, :, ::stride]
    return out


if __name__ == "__main__":
    key = jax.random.PRNGKey(0)
    kx, kw, kb = jax.random.split(key, 3)

    # Small shapes consistent with how SepConv1d is used in LSTMConv:
    # SepConv1d(ni, no, kernel=8, stride=1, pad=1), activ=ReLU, drop=None.
    N, ni, no, K, stride, pad, L = 2, 4, 32, 8, 1, 1, 128

    x = jax.random.normal(kx, (N, ni, L), jnp.float32)
    w = 0.1 * jax.random.normal(kw, (no, ni, K), jnp.float32)
    b = 0.1 * jax.random.normal(kb, (no,), jnp.float32)

    out = sepconv1d(x, w, b, stride=stride, pad=pad, relu=True)
    out = jax.block_until_ready(out)

    # Reference: XLA conv + bias + ReLU (eval mode, dropout identity).
    ref = lax.conv_general_dilated(
        x, w, window_strides=(stride,), padding=[(pad, pad)],
        dimension_numbers=("NCH", "OIH", "NCH"))
    ref = jnp.maximum(ref + b[None, :, None], 0.0)

    assert out.shape == ref.shape, (out.shape, ref.shape)
    assert bool(jnp.all(jnp.isfinite(out)))
    # Loose tolerance: both paths may use bf16-pass MXU matmuls for f32.
    assert bool(jnp.allclose(out, ref, atol=2e-2, rtol=2e-2)), (
        float(jnp.max(jnp.abs(out - ref))))
    print("KERNEL_OK")
</pallas_src>

<mosaic_0001>
module attributes {stable_mosaic.version = 11 : i64} {
  func.func @_sepconv1d_kernel(%arg0: i32, %arg1: memref<2x4x128xf32, #tpu.memory_space<vmem>>, %arg2: memref<32x64xf32, #tpu.memory_space<vmem>>, %arg3: memref<32x1xf32, #tpu.memory_space<vmem>>, %arg4: memref<2x32x123xf32, #tpu.memory_space<vmem>>, %arg5: memref<8x130xf32, #tpu.memory_space<vmem>>, %arg6: memref<64x123xf32, #tpu.memory_space<vmem>>) attributes {dimension_semantics = [#tpu.dimension_semantics<parallel>], iteration_bounds = array<i64: 1>, scalar_prefetch = 0 : i64, scratch_operands = 2 : i64, tpu.core_type = #tpu.core_type<tc>, window_params = [{transform_indices = @transform_0, window_bounds = array<i64: 2, 4, 128>}, {pipeline_mode = #tpu.pipeline_mode<synchronous>, transform_indices = @transform_1, window_bounds = array<i64: 32, 64>}, {pipeline_mode = #tpu.pipeline_mode<synchronous>, transform_indices = @transform_2, window_bounds = array<i64: 32, 1>}, {transform_indices = @transform_3, window_bounds = array<i64: 2, 32, 123>}]} {
    %c0 = arith.constant 0 : index
    %c0_0 = arith.constant 0 : index
    %0 = vector.load %arg2[%c0, %c0_0] : memref<32x64xf32, #tpu.memory_space<vmem>>, vector<32x64xf32>
    %c0_1 = arith.constant 0 : index
    %c0_2 = arith.constant 0 : index
    %1 = vector.load %arg3[%c0_1, %c0_2] : memref<32x1xf32, #tpu.memory_space<vmem>>, vector<32x1xf32>
    %cst = arith.constant 0.000000e+00 : f32
    %2 = vector.broadcast %cst : f32 to vector<8x130xf32>
    %c0_3 = arith.constant 0 : index
    %c0_4 = arith.constant 0 : index
    %3 = vector.load %arg5[%c0_3, %c0_4] : memref<8x130xf32, #tpu.memory_space<vmem>>, vector<8x130xf32>
    tpu.vector_store %arg5[%c0_3, %c0_4], %2 {strides = array<i32>} : memref<8x130xf32, #tpu.memory_space<vmem>>, vector<8x130xf32>,
    %c0_5 = arith.constant 0 : index
    %c0_6 = arith.constant 0 : index
    %c0_7 = arith.constant 0 : index
    %4 = vector.load %arg1[%c0_5, %c0_6, %c0_7] : memref<2x4x128xf32, #tpu.memory_space<vmem>>, vector<1x4x128xf32>
    %5 = vector.shape_cast %4 : vector<1x4x128xf32> to vector<4x128xf32>
    %c0_8 = arith.constant 0 : index
    %c1 = arith.constant 1 : index
    %6 = vector.load %arg5[%c0_8, %c1] : memref<8x130xf32, #tpu.memory_space<vmem>>, vector<4x128xf32>
    tpu.vector_store %arg5[%c0_8, %c1], %5 {strides = array<i32>} : memref<8x130xf32, #tpu.memory_space<vmem>>, vector<4x128xf32>,
    %c0_9 = arith.constant 0 : index
    %c0_10 = arith.constant 0 : index
    %7 = vector.load %arg5[%c0_9, %c0_10] : memref<8x130xf32, #tpu.memory_space<vmem>>, vector<8x130xf32>
    %8 = vector.extract_strided_slice %7 {offsets = [0, 0], sizes = [8, 123], strides = [1, 1]} : vector<8x130xf32> to vector<8x123xf32>
    %c0_11 = arith.constant 0 : index
    %c0_12 = arith.constant 0 : index
    %9 = vector.load %arg6[%c0_11, %c0_12] : memref<64x123xf32, #tpu.memory_space<vmem>>, vector<8x123xf32>
    tpu.vector_store %arg6[%c0_11, %c0_12], %8 {strides = array<i32>} : memref<64x123xf32, #tpu.memory_space<vmem>>, vector<8x123xf32>,
    %10 = vector.extract_strided_slice %7 {offsets = [0, 1], sizes = [8, 123], strides = [1, 1]} : vector<8x130xf32> to vector<8x123xf32>
    %c8 = arith.constant 8 : index
    %c0_13 = arith.constant 0 : index
    %11 = vector.load %arg6[%c8, %c0_13] : memref<64x123xf32, #tpu.memory_space<vmem>>, vector<8x123xf32>
    tpu.vector_store %arg6[%c8, %c0_13], %10 {strides = array<i32>} : memref<64x123xf32, #tpu.memory_space<vmem>>, vector<8x123xf32>,
    %12 = vector.extract_strided_slice %7 {offsets = [0, 2], sizes = [8, 123], strides = [1, 1]} : vector<8x130xf32> to vector<8x123xf32>
    %c16 = arith.constant 16 : index
    %c0_14 = arith.constant 0 : index
    %13 = vector.load %arg6[%c16, %c0_14] : memref<64x123xf32, #tpu.memory_space<vmem>>, vector<8x123xf32>
    tpu.vector_store %arg6[%c16, %c0_14], %12 {strides = array<i32>} : memref<64x123xf32, #tpu.memory_space<vmem>>, vector<8x123xf32>,
    %14 = vector.extract_strided_slice %7 {offsets = [0, 3], sizes = [8, 123], strides = [1, 1]} : vector<8x130xf32> to vector<8x123xf32>
    %c24 = arith.constant 24 : index
    %c0_15 = arith.constant 0 : index
    %15 = vector.load %arg6[%c24, %c0_15] : memref<64x123xf32, #tpu.memory_space<vmem>>, vector<8x123xf32>
    tpu.vector_store %arg6[%c24, %c0_15], %14 {strides = array<i32>} : memref<64x123xf32, #tpu.memory_space<vmem>>, vector<8x123xf32>,
    %16 = vector.extract_strided_slice %7 {offsets = [0, 4], sizes = [8, 123], strides = [1, 1]} : vector<8x130xf32> to vector<8x123xf32>
    %c32 = arith.constant 32 : index
    %c0_16 = arith.constant 0 : index
    %17 = vector.load %arg6[%c32, %c0_16] : memref<64x123xf32, #tpu.memory_space<vmem>>, vector<8x123xf32>
    tpu.vector_store %arg6[%c32, %c0_16], %16 {strides = array<i32>} : memref<64x123xf32, #tpu.memory_space<vmem>>, vector<8x123xf32>,
    %18 = vector.extract_strided_slice %7 {offsets = [0, 5], sizes = [8, 123], strides = [1, 1]} : vector<8x130xf32> to vector<8x123xf32>
    %c40 = arith.constant 40 : index
    %c0_17 = arith.constant 0 : index
    %19 = vector.load %arg6[%c40, %c0_17] : memref<64x123xf32, #tpu.memory_space<vmem>>, vector<8x123xf32>
    tpu.vector_store %arg6[%c40, %c0_17], %18 {strides = array<i32>} : memref<64x123xf32, #tpu.memory_space<vmem>>, vector<8x123xf32>,
    %20 = vector.extract_strided_slice %7 {offsets = [0, 6], sizes = [8, 123], strides = [1, 1]} : vector<8x130xf32> to vector<8x123xf32>
    %c48 = arith.constant 48 : index
    %c0_18 = arith.constant 0 : index
    %21 = vector.load %arg6[%c48, %c0_18] : memref<64x123xf32, #tpu.memory_space<vmem>>, vector<8x123xf32>
    tpu.vector_store %arg6[%c48, %c0_18], %20 {strides = array<i32>} : memref<64x123xf32, #tpu.memory_space<vmem>>, vector<8x123xf32>,
    %22 = vector.extract_strided_slice %7 {offsets = [0, 7], sizes = [8, 123], strides = [1, 1]} : vector<8x130xf32> to vector<8x123xf32>
    %c56 = arith.constant 56 : index
    %c0_19 = arith.constant 0 : index
    %23 = vector.load %arg6[%c56, %c0_19] : memref<64x123xf32, #tpu.memory_space<vmem>>, vector<8x123xf32>
    tpu.vector_store %arg6[%c56, %c0_19], %22 {strides = array<i32>} : memref<64x123xf32, #tpu.memory_space<vmem>>, vector<8x123xf32>,
    %c0_20 = arith.constant 0 : index
    %c0_21 = arith.constant 0 : index
    %24 = vector.load %arg6[%c0_20, %c0_21] : memref<64x123xf32, #tpu.memory_space<vmem>>, vector<64x123xf32>
    %cst_22 = arith.constant dense<0.000000e+00> : vector<32x123xf32>
    %25 = tpu.matmul %0, %24, %cst_22 {dimension_numbers = #tpu.dot_dimension_numbers<[1], [0], [0], [1], [0, 0, 1, 1], [], []>} : vector<32x64xf32>, vector<64x123xf32>, vector<32x123xf32> -> vector<32x123xf32>
    %26 = vector.broadcast %1 : vector<32x1xf32> to vector<32x123xf32>
    %27 = arith.addf %25, %26 : vector<32x123xf32>
    %cst_23 = arith.constant 0.000000e+00 : f32
    %28 = vector.broadcast %cst_23 : f32 to vector<32x123xf32>
    %29 = arith.maximumf %27, %28 : vector<32x123xf32>
    %c0_24 = arith.constant 0 : index
    %c0_25 = arith.constant 0 : index
    %c0_26 = arith.constant 0 : index
    %30 = vector.load %arg4[%c0_24, %c0_25, %c0_26] : memref<2x32x123xf32, #tpu.memory_space<vmem>>, vector<1x32x123xf32>
    %31 = vector.shape_cast %30 : vector<1x32x123xf32> to vector<32x123xf32>
    %32 = vector.shape_cast %29 : vector<32x123xf32> to vector<1x32x123xf32>
    tpu.vector_store %arg4[%c0_24, %c0_25, %c0_26], %32 {strides = array<i32>} : memref<2x32x123xf32, #tpu.memory_space<vmem>>, vector<1x32x123xf32>,
    %c1_27 = arith.constant 1 : index
    %c0_28 = arith.constant 0 : index
    %c0_29 = arith.constant 0 : index
    %33 = vector.load %arg1[%c1_27, %c0_28, %c0_29] : memref<2x4x128xf32, #tpu.memory_space<vmem>>, vector<1x4x128xf32>
    %34 = vector.shape_cast %33 : vector<1x4x128xf32> to vector<4x128xf32>
    %c0_30 = arith.constant 0 : index
    %c1_31 = arith.constant 1 : index
    %35 = vector.load %arg5[%c0_30, %c1_31] : memref<8x130xf32, #tpu.memory_space<vmem>>, vector<4x128xf32>
    tpu.vector_store %arg5[%c0_30, %c1_31], %34 {strides = array<i32>} : memref<8x130xf32, #tpu.memory_space<vmem>>, vector<4x128xf32>,
    %c0_32 = arith.constant 0 : index
    %c0_33 = arith.constant 0 : index
    %36 = vector.load %arg5[%c0_32, %c0_33] : memref<8x130xf32, #tpu.memory_space<vmem>>, vector<8x130xf32>
    %37 = vector.extract_strided_slice %36 {offsets = [0, 0], sizes = [8, 123], strides = [1, 1]} : vector<8x130xf32> to vector<8x123xf32>
    %c0_34 = arith.constant 0 : index
    %c0_35 = arith.constant 0 : index
    %38 = vector.load %arg6[%c0_34, %c0_35] : memref<64x123xf32, #tpu.memory_space<vmem>>, vector<8x123xf32>
    tpu.vector_store %arg6[%c0_34, %c0_35], %37 {strides = array<i32>} : memref<64x123xf32, #tpu.memory_space<vmem>>, vector<8x123xf32>,
    %39 = vector.extract_strided_slice %36 {offsets = [0, 1], sizes = [8, 123], strides = [1, 1]} : vector<8x130xf32> to vector<8x123xf32>
    %c8_36 = arith.constant 8 : index
    %c0_37 = arith.constant 0 : index
    %40 = vector.load %arg6[%c8_36, %c0_37] : memref<64x123xf32, #tpu.memory_space<vmem>>, vector<8x123xf32>
    tpu.vector_store %arg6[%c8_36, %c0_37], %39 {strides = array<i32>} : memref<64x123xf32, #tpu.memory_space<vmem>>, vector<8x123xf32>,
    %41 = vector.extract_strided_slice %36 {offsets = [0, 2], sizes = [8, 123], strides = [1, 1]} : vector<8x130xf32> to vector<8x123xf32>
    %c16_38 = arith.constant 16 : index
    %c0_39 = arith.constant 0 : index
    %42 = vector.load %arg6[%c16_38, %c0_39] : memref<64x123xf32, #tpu.memory_space<vmem>>, vector<8x123xf32>
    tpu.vector_store %arg6[%c16_38, %c0_39], %41 {strides = array<i32>} : memref<64x123xf32, #tpu.memory_space<vmem>>, vector<8x123xf32>,
    %43 = vector.extract_strided_slice %36 {offsets = [0, 3], sizes = [8, 123], strides = [1, 1]} : vector<8x130xf32> to vector<8x123xf32>
    %c24_40 = arith.constant 24 : index
    %c0_41 = arith.constant 0 : index
    %44 = vector.load %arg6[%c24_40, %c0_41] : memref<64x123xf32, #tpu.memory_space<vmem>>, vector<8x123xf32>
    tpu.vector_store %arg6[%c24_40, %c0_41], %43 {strides = array<i32>} : memref<64x123xf32, #tpu.memory_space<vmem>>, vector<8x123xf32>,
    %45 = vector.extract_strided_slice %36 {offsets = [0, 4], sizes = [8, 123], strides = [1, 1]} : vector<8x130xf32> to vector<8x123xf32>
    %c32_42 = arith.constant 32 : index
    %c0_43 = arith.constant 0 : index
    %46 = vector.load %arg6[%c32_42, %c0_43] : memref<64x123xf32, #tpu.memory_space<vmem>>, vector<8x123xf32>
    tpu.vector_store %arg6[%c32_42, %c0_43], %45 {strides = array<i32>} : memref<64x123xf32, #tpu.memory_space<vmem>>, vector<8x123xf32>,
    %47 = vector.extract_strided_slice %36 {offsets = [0, 5], sizes = [8, 123], strides = [1, 1]} : vector<8x130xf32> to vector<8x123xf32>
    %c40_44 = arith.constant 40 : index
    %c0_45 = arith.constant 0 : index
    %48 = vector.load %arg6[%c40_44, %c0_45] : memref<64x123xf32, #tpu.memory_space<vmem>>, vector<8x123xf32>
    tpu.vector_store %arg6[%c40_44, %c0_45], %47 {strides = array<i32>} : memref<64x123xf32, #tpu.memory_space<vmem>>, vector<8x123xf32>,
    %49 = vector.extract_strided_slice %36 {offsets = [0, 6], sizes = [8, 123], strides = [1, 1]} : vector<8x130xf32> to vector<8x123xf32>
    %c48_46 = arith.constant 48 : index
    %c0_47 = arith.constant 0 : index
    %50 = vector.load %arg6[%c48_46, %c0_47] : memref<64x123xf32, #tpu.memory_space<vmem>>, vector<8x123xf32>
    tpu.vector_store %arg6[%c48_46, %c0_47], %49 {strides = array<i32>} : memref<64x123xf32, #tpu.memory_space<vmem>>, vector<8x123xf32>,
    %51 = vector.extract_strided_slice %36 {offsets = [0, 7], sizes = [8, 123], strides = [1, 1]} : vector<8x130xf32> to vector<8x123xf32>
    %c56_48 = arith.constant 56 : index
    %c0_49 = arith.constant 0 : index
    %52 = vector.load %arg6[%c56_48, %c0_49] : memref<64x123xf32, #tpu.memory_space<vmem>>, vector<8x123xf32>
    tpu.vector_store %arg6[%c56_48, %c0_49], %51 {strides = array<i32>} : memref<64x123xf32, #tpu.memory_space<vmem>>, vector<8x123xf32>,
    %c0_50 = arith.constant 0 : index
    %c0_51 = arith.constant 0 : index
    %53 = vector.load %arg6[%c0_50, %c0_51] : memref<64x123xf32, #tpu.memory_space<vmem>>, vector<64x123xf32>
    %cst_52 = arith.constant dense<0.000000e+00> : vector<32x123xf32>
    %54 = tpu.matmul %0, %53, %cst_52 {dimension_numbers = #tpu.dot_dimension_numbers<[1], [0], [0], [1], [0, 0, 1, 1], [], []>} : vector<32x64xf32>, vector<64x123xf32>, vector<32x123xf32> -> vector<32x123xf32>
    %55 = vector.broadcast %1 : vector<32x1xf32> to vector<32x123xf32>
    %56 = arith.addf %54, %55 : vector<32x123xf32>
    %cst_53 = arith.constant 0.000000e+00 : f32
    %57 = vector.broadcast %cst_53 : f32 to vector<32x123xf32>
    %58 = arith.maximumf %56, %57 : vector<32x123xf32>
    %c1_54 = arith.constant 1 : index
    %c0_55 = arith.constant 0 : index
    %c0_56 = arith.constant 0 : index
    %59 = vector.load %arg4[%c1_54, %c0_55, %c0_56] : memref<2x32x123xf32, #tpu.memory_space<vmem>>, vector<1x32x123xf32>
    %60 = vector.shape_cast %59 : vector<1x32x123xf32> to vector<32x123xf32>
    %61 = vector.shape_cast %58 : vector<32x123xf32> to vector<1x32x123xf32>
    tpu.vector_store %arg4[%c1_54, %c0_55, %c0_56], %61 {strides = array<i32>} : memref<2x32x123xf32, #tpu.memory_space<vmem>>, vector<1x32x123xf32>,
    return
  }
  func.func @transform_0(%arg0: i32) -> (i32, i32, i32) {
    %c0_i32 = arith.constant 0 : i32
    %c0_i32_0 = arith.constant 0 : i32
    %c0_i32_1 = arith.constant 0 : i32
    return %arg0, %c0_i32, %c0_i32_0 : i32, i32, i32
  }
  func.func @transform_1(%arg0: i32) -> (i32, i32) {
    %c0_i32 = arith.constant 0 : i32
    %c0_i32_0 = arith.constant 0 : i32
    %c0_i32_1 = arith.constant 0 : i32
    return %c0_i32, %c0_i32_0 : i32, i32
  }
  func.func @transform_2(%arg0: i32) -> (i32, i32) {
    %c0_i32 = arith.constant 0 : i32
    %c0_i32_0 = arith.constant 0 : i32
    %c0_i32_1 = arith.constant 0 : i32
    return %c0_i32, %c0_i32_0 : i32, i32
  }
  func.func @transform_3(%arg0: i32) -> (i32, i32, i32) {
    %c0_i32 = arith.constant 0 : i32
    %c0_i32_0 = arith.constant 0 : i32
    %c0_i32_1 = arith.constant 0 : i32
    return %arg0, %c0_i32, %c0_i32_0 : i32, i32, i32
  }
}

</mosaic_0001>

<bundles_post_ra>
// kernel: tpu_custom_call.1
= control target key start
LH: loop header
LB: loop body
LE: loop exit
PB: predicated region body
PF: predicated region fallthrough
CT: control target
= control target key end

     0   :  { %8 = vsyncpa [#allocation5], 0  ;;  %s482_s0 = inlined_call_operand.hbm [shape: f32[2,4,128], index: 0, kind: input, shape index: {}]   ;;  %s483_s1 = inlined_call_operand.vmem [shape: f32[32,64], index: 1, kind: input, shape index: {}]   ;;  %s484_s2 = inlined_call_operand.vmem [shape: f32[32,1], index: 2, kind: input, shape index: {}]   ;;  %s485_s3 = inlined_call_operand.hbm [shape: f32[2,32,123], index: 3, kind: output, shape index: {}]  }
   0x1   :  { %9 = vsyncpa [#allocation6], 0  ;;  %s14_s14 = sshll.u32 %s482_s0, 4  ;;  %s378_s15 = smov [#allocation4]   ;;  %s15_s14 = int_to_ptr.hbm [resolvable:$true] %s14_s14 }
   0x2   :  { %s16_s16 = sshll.u32 %s378_s15, 4  ;;  %s379_s17 = smov 64   ;;  %s17_s16 = int_to_ptr.vmem [resolvable:$true] %s16_s16 }
   0x3   :  { %s380_s18 = smov 4  }
   0x4   :  { %22 = dma.hbm_to_vmem [thread:$0]  %s15_s14, 128, %s17_s16, [#allocation5], %s379_s17, %s379_s17, %s380_s18  }
   0x5   :  { %374 = dma.done.wait [#allocation5], 128  }
   0x6   :  { %375 = vsyncadd [#allocation5], 4294967168  ;;  %vm40_vm0 = vcmask 15360   ;;  %v381_v0 = vmov 0.0   ;;  %v42_v1 = vld [vmem:[#allocation4] sm:$0xf] }
   0x7   :  { %39 = vst [vmem:[#allocation2] sm:$0xff] %v381_v0  ;;  %s382_s19 = smov 1   ;;  %v172_v2 = vld [vmem:[#allocation4 + $0x4] sm:$0xf]  ;;  %vm47_vm1 = vcmask 1043464   ;;  %vm49_vm2 = vcmask 3072  }
   0x8   :  { %41 = vst.msk [vmem:[#allocation2 + $0x8] sm:$0xff] %vm40_vm0, %v381_v0  ;;  %44 = vrot.lane.b32.xlu0 %v42_v1, %s382_s19  ;;  %vm53_vm3 = vcmask 1006592   ;;  %s383_s0 = smov 123   ;;  %s384_s20 = smov 122   ;;  %vm81_vm4 = vcmask 998400   ;;  %vm89_vm5 = vcmask 990208  }
   0x9   :  { %s385_s21 = smov 121   ;;  %s386_s22 = smov 127   ;;  %v37_v37 = vld [vmem:[%s484_s2 + $0x10] sm:$0xff]  ;;  %v36_v38 = vld [vmem:[%s484_s2 + $0x8] sm:$0xff]  ;;  %v390_v39 = vmov 0   ;;  %v35_v40 = vld [vmem:[%s484_s2] sm:$0xff] }
   0xa   :  { %s387_s23 = smov 124   ;;  %s388_s24 = smov 125   ;;  %325 = vset.pattern.permute.xlu1 %v390_v39  ;;  %324 = vset.pattern.permute.xlu0 %v390_v39  ;;  %v33_v45 = vld [vmem:[%s483_s1 + $0x10] sm:$0xff]  ;;  %vm121_vm6 = vcmask 523264   ;;  %v31_v46 = vld [vmem:[%s483_s1] sm:$0xff]  ;;  %v38_v47 = vld [vmem:[%s484_s2 + $0x18] sm:$0xff] }
   0xb   :  { %s389_s25 = smov 126   ;;  %323 = vset.pattern.permute.xlu2 %v390_v39  ;;  %v34_v51 = vld [vmem:[%s483_s1 + $0x18] sm:$0xff]  ;;  %v32_v52 = vld [vmem:[%s483_s1 + $0x8] sm:$0xff]  ;;  %s391_s1 = smov [#allocation7]  }
   0xc   :  { %s268_s14 = sshll.u32 %s391_s1, 4  ;;  %s270_s17 = sshll.u32 %s485_s3, 4  ;;  %s269_s14 = int_to_ptr.vmem [resolvable:$true] %s268_s14  ;;  %s271_s17 = int_to_ptr.hbm [resolvable:$true] %s270_s17 }
   0xd   :  { %s392_s18 = smov 128  }
  0x10   :  { %174 = vrot.lane.b32.xlu0 %v172_v2, %s382_s19  ;;  %s393_s19 = smov 8  }
  0x7a   :  { %v45_v3 = vpop.permute.xlu0 %44 }
  0x7b   :  { %48 = vst.msk [vmem:[#allocation2] sm:$0xf] %vm47_vm1, %v45_v3 }
  0x7c   :  { %50 = vst.msk [vmem:[#allocation2 + $0x8] sm:$0xf] %vm49_vm2, %v45_v3 }
  0x82   :  { %v175_v4 = vpop.permute.xlu0 %174  ;;  %v51_v5 = vld [vmem:[#allocation2] sm:$0xff] }
  0x83   :  { %v52_v6 = vld [vmem:[#allocation2 + $0x8] sm:$0xff]  ;;  %177 = vst.msk [vmem:[#allocation2] sm:$0xf] %vm47_vm1, %v175_v4  ;;  %72 = vrot.lane.b32.xlu0 %v51_v5, %s383_s0  ;;  %77 = vrot.lane.b32.xlu2 %v51_v5, %s384_s20 }
  0x84   :  { %178 = vst.msk [vmem:[#allocation2 + $0x8] sm:$0xf] %vm49_vm2, %v175_v4  ;;  %85 = vrot.lane.b32.xlu1 %v51_v5, %s385_s21 }
  0x85   :  { %54 = vst.msk [vmem:[#allocation3] sm:$0xff] %vm53_vm3, %v51_v5 }
  0x8a   :  { %v179_v7 = vld [vmem:[#allocation2] sm:$0xff] }
  0x8b   :  { %v180_v8 = vld [vmem:[#allocation2 + $0x8] sm:$0xff]  ;;  %79 = vrot.lane.b32.xlu2 %v52_v6, %s384_s20 }
  0x8c   :  { %213 = vrot.lane.b32.xlu0 %v180_v8, %s385_s21  ;;  %87 = vrot.lane.b32.xlu1 %v52_v6, %s385_s21  ;;  %v418_v9 = vld [vmem:[#allocation3] sm:$0xff] }
  0x8d   :  { %181 = vst.msk [vmem:[#allocation3] sm:$0xff] %vm53_vm3, %v179_v7 }
  0x93   :  { %56 = vrot.lane.b32.xlu2 %v51_v5, %s386_s22 }
  0x94   :  { %206 = vrot.lane.b32.xlu0 %v180_v8, %s384_s20  ;;  %68 = vrot.lane.b32.xlu1 %v51_v5, %s387_s23  ;;  %v218_v55 = vld [vmem:[#allocation3] sm:$0xff] }
  0x9b   :  { %211 = vrot.lane.b32.xlu2 %v179_v7, %s385_s21 }
  0x9c   :  { %64 = vrot.lane.b32.xlu1 %v51_v5, %s388_s24  ;;  %199 = vrot.lane.b32.xlu0 %v179_v7, %s383_s0 }
  0xa3   :  { %204 = vrot.lane.b32.xlu2 %v179_v7, %s384_s20 }
  0xa4   :  { %60 = vrot.lane.b32.xlu1 %v51_v5, %s389_s25  ;;  %187 = vrot.lane.b32.xlu0 %v179_v7, %s389_s25 }
  0xab   :  { %191 = vrot.lane.b32.xlu2 %v179_v7, %s388_s24 }
  0xac   :  { %195 = vrot.lane.b32.xlu1 %v179_v7, %s387_s23  ;;  %108 = vperm.xlu0 %324, %v36_v38  }
  0xb3   :  { %103 = vperm.xlu2 %323, %v35_v40  }
  0xb4   :  { %183 = vrot.lane.b32.xlu1 %v179_v7, %s386_s22 }
  0xbb   :  { %118 = vperm.xlu2 %323, %v38_v47  }
  0xbc   :  { %113 = vperm.xlu1 %325, %v37_v37  }
  0xdd   :  { %v78_v10 = vpop.permute.xlu2 %77 }
  0xe5   :  { %v80_v11 = vpop.permute.xlu2 %79 }
  0xe6   :  { %v82_v12 = vsel %vm81_vm4, %v78_v10, %v80_v11 }
  0xe7   :  { %84 = vst.msk [vmem:[#allocation3 + $0x30] sm:$0xff] %vm53_vm3, %v82_v12 }
  0xed   :  { %v57_v13 = vpop.permute.xlu2 %56 }
  0xee   :  { %59 = vst.msk [vmem:[#allocation3 + $0x8] sm:$0xff] %vm53_vm3, %v57_v13  ;;  %v99_v26 = vld [vmem:[#allocation3 + $0x30] sm:$0xff] }
  0xf5   :  { %v73_v14 = vpop.permute.xlu0 %72  ;;  %v212_v16 = vpop.permute.xlu2 %211  ;;  %v94_v44 = vld [vmem:[#allocation3 + $0x8] sm:$0xff] }
  0xf6   :  { %75 = vst.msk [vmem:[#allocation3 + $0x28] sm:$0xff] %vm53_vm3, %v73_v14  ;;  %v86_v15 = vpop.permute.xlu1 %85 }
  0xfd   :  { %v205_v20 = vpop.permute.xlu2 %204  ;;  %v98_v27 = vld [vmem:[#allocation3 + $0x28] sm:$0xff] }
  0xfe   :  { %v214_v17 = vpop.permute.xlu0 %213  ;;  %v88_v18 = vpop.permute.xlu1 %87 }
  0xff   :  { %v90_v19 = vsel %vm89_vm5, %v86_v15, %v88_v18  ;;  %v215_v23 = vsel %vm89_vm5, %v212_v16, %v214_v17 }
 0x100   :  { %92 = vst.msk [vmem:[#allocation3 + $0x38] sm:$0xff] %vm53_vm3, %v90_v19 }
 0x105   :  { %v192_v35 = vpop.permute.xlu2 %191 }
 0x106   :  { %v207_v21 = vpop.permute.xlu0 %206  ;;  %v69_v22 = vpop.permute.xlu1 %68 }
 0x107   :  { %v208_v24 = vsel %vm81_vm4, %v205_v20, %v207_v21  ;;  %71 = vst.msk [vmem:[#allocation3 + $0x20] sm:$0xff] %vm53_vm3, %v69_v22  ;;  %v100_v25 = vld [vmem:[#allocation3 + $0x38] sm:$0xff] }
 0x108   :  { %142 = vmatpush.msra.mxu0 %v100_v25  ;;  %217 = vst.msk [vmem:[#allocation3 + $0x38] sm:$0xff] %vm53_vm3, %v215_v23  ;;  %291 = vmatpush.msra.mxu2 %v100_v25 }
 0x109   :  { %210 = vst.msk [vmem:[#allocation3 + $0x30] sm:$0xff] %vm53_vm3, %v208_v24 }
 0x10a   :  { %143 = vmatpush.msra.mxu0 %v99_v26  ;;  %292 = vmatpush.msra.mxu2 %v99_v26 }
 0x10c   :  { %144 = vmatpush.msra.mxu0 %v98_v27  ;;  %293 = vmatpush.msra.mxu2 %v98_v27 }
 0x10d   :  { %v104_v56 = vpop.permute.xlu2 %103 }
 0x10e   :  { %v65_v28 = vpop.permute.xlu1 %64  ;;  %v200_v29 = vpop.permute.xlu0 %199  ;;  %v97_v30 = vld [vmem:[#allocation3 + $0x20] sm:$0xff] }
 0x10f   :  { %67 = vst.msk [vmem:[#allocation3 + $0x18] sm:$0xff] %vm53_vm3, %v65_v28  ;;  %145 = vmatpush.msra.mxu0 %v97_v30  ;;  %294 = vmatpush.msra.mxu2 %v97_v30  ;;  %v225_v31 = vld [vmem:[#allocation3 + $0x38] sm:$0xff] }
 0x110   :  { %202 = vst.msk [vmem:[#allocation3 + $0x28] sm:$0xff] %vm53_vm3, %v200_v29  ;;  %234 = vmatpush.msra.mxu1 %v225_v31  ;;  %299 = vmatpush.msra.mxu3 %v225_v31  ;;  %v224_v32 = vld [vmem:[#allocation3 + $0x30] sm:$0xff] }
 0x112   :  { %235 = vmatpush.msra.mxu1 %v224_v32  ;;  %300 = vmatpush.msra.mxu3 %v224_v32 }
 0x115   :  { %v119_v4 = vpop.permute.xlu2 %118 }
 0x116   :  { %v61_v33 = vpop.permute.xlu1 %60  ;;  %v96_v34 = vld [vmem:[#allocation3 + $0x18] sm:$0xff]  ;;  %v188_v43 = vpop.permute.xlu0 %187 }
 0x117   :  { %63 = vst.msk [vmem:[#allocation3 + $0x10] sm:$0xff] %vm53_vm3, %v61_v33  ;;  %146 = vmatpush.msra.mxu0 %v96_v34  ;;  %295 = vmatpush.msra.mxu2 %v96_v34  ;;  %v223_v36 = vld [vmem:[#allocation3 + $0x28] sm:$0xff] }
 0x118   :  { %194 = vst.msk [vmem:[#allocation3 + $0x18] sm:$0xff] %vm53_vm3, %v192_v35  ;;  %236 = vmatpush.msra.mxu1 %v223_v36  ;;  %301 = vmatpush.msra.mxu3 %v223_v36 }
 0x11e   :  { %v196_v41 = vpop.permute.xlu1 %195  ;;  %v95_v42 = vld [vmem:[#allocation3 + $0x10] sm:$0xff]  ;;  %v109_v62 = vpop.permute.xlu0 %108 }
 0x11f   :  { %198 = vst.msk [vmem:[#allocation3 + $0x20] sm:$0xff] %vm53_vm3, %v196_v41  ;;  %147 = vmatpush.msra.mxu0 %v95_v42  ;;  %296 = vmatpush.msra.mxu2 %v95_v42  ;;  %v221_v50 = vld [vmem:[#allocation3 + $0x18] sm:$0xff] }
 0x120   :  { %190 = vst.msk [vmem:[#allocation3 + $0x10] sm:$0xff] %vm53_vm3, %v188_v43 }
 0x121   :  { %148 = vmatpush.msra.mxu0 %v94_v44  ;;  %297 = vmatpush.msra.mxu2 %v94_v44 }
 0x123   :  { %149 = vmatpush.msra.mxu0 %v418_v9  ;;  %298 = vmatpush.msra.mxu2 %v418_v9 }
 0x124   :  { %285 = vmatmul.msk.f32.vlgmr.msra.gmra.mxu2 %vm121_vm6, %v33_v45  ;;  %283 = vmatmul.msk.f32.vlgmr.msra.gmra.mxu0 %vm121_vm6, %v31_v46 }
 0x126   :  { %v184_v48 = vpop.permute.xlu1 %183  ;;  %v222_v49 = vld [vmem:[#allocation3 + $0x20] sm:$0xff] }
 0x127   :  { %186 = vst.msk [vmem:[#allocation3 + $0x8] sm:$0xff] %vm53_vm3, %v184_v48  ;;  %237 = vmatpush.msra.mxu1 %v222_v49  ;;  %302 = vmatpush.msra.mxu3 %v222_v49  ;;  %v220_v53 = vld [vmem:[#allocation3 + $0x10] sm:$0xff] }
 0x129   :  { %238 = vmatpush.msra.mxu1 %v221_v50  ;;  %303 = vmatpush.msra.mxu3 %v221_v50 }
 0x12b   :  { %239 = vmatpush.msra.mxu1 %v220_v53  ;;  %304 = vmatpush.msra.mxu3 %v220_v53 }
 0x12c   :  { %286 = vmatmul.msk.f32.gmra.mxu2 %vm121_vm6, %v34_v51  ;;  %284 = vmatmul.msk.f32.gmra.mxu0 %vm121_vm6, %v32_v52 }
 0x12e   :  { %v219_v54 = vld [vmem:[#allocation3 + $0x8] sm:$0xff]  ;;  %v114_v60 = vpop.permute.xlu1 %113 }
 0x12f   :  { %240 = vmatpush.msra.mxu1 %v219_v54  ;;  %305 = vmatpush.msra.mxu3 %v219_v54 }
 0x131   :  { %241 = vmatpush.msra.mxu1 %v218_v55  ;;  %306 = vmatpush.msra.mxu3 %v218_v55 }
 0x132   :  { %289 = vmatmul.msk.f32.vlgmr.msra.gmra.mxu3 %vm121_vm6, %v33_v45  ;;  %287 = vmatmul.msk.f32.vlgmr.msra.gmra.mxu1 %vm121_vm6, %v31_v46 }
 0x13a   :  { %290 = vmatmul.msk.f32.gmra.mxu3 %vm121_vm6, %v34_v51  ;;  %288 = vmatmul.msk.f32.gmra.mxu1 %vm121_vm6, %v32_v52 }
 0x1a1   :  { %v151_v57 = vpop.f32.mrf.mxu0 }
 0x1a2   :  { %v152_v58 = vadd.f32 %v151_v57, %v104_v56 }
 0x1a4   :  { %v163_v59 = vmax.f32 %v152_v58, 0.0 }
 0x1a6   :  { %167 = vst.msk [vmem:[#allocation7] sm:$0xff] %vm53_vm3, %v163_v59 }
 0x1a7   :  { %v157_v61 = vpop.f32.mrf.mxu2 }
 0x1a8   :  { %v158_v63 = vadd.f32 %v157_v61, %v114_v60 }
 0x1a9   :  { %v154_v0 = vpop.f32.mrf.mxu0 }
 0x1aa   :  { %v165_v1 = vmax.f32 %v158_v63, 0.0  ;;  %v155_v2 = vadd.f32 %v154_v0, %v109_v62 }
 0x1ac   :  { %169 = vst.msk [vmem:[#allocation7 + $0x10] sm:$0xff] %vm53_vm3, %v165_v1  ;;  %v164_v3 = vmax.f32 %v155_v2, 0.0 }
 0x1ae   :  { %168 = vst.msk [vmem:[#allocation7 + $0x8] sm:$0xff] %vm53_vm3, %v164_v3 }
 0x1af   :  { %v160_v5 = vpop.f32.mrf.mxu2  ;;  %v243_v6 = vpop.f32.mrf.mxu1 }
 0x1b0   :  { %v161_v7 = vadd.f32 %v160_v5, %v119_v4  ;;  %v244_v8 = vadd.f32 %v243_v6, %v104_v56 }
 0x1b2   :  { %v166_v9 = vmax.f32 %v161_v7, 0.0  ;;  %v255_v10 = vmax.f32 %v244_v8, 0.0 }
 0x1b4   :  { %170 = vst.msk [vmem:[#allocation7 + $0x18] sm:$0xff] %vm53_vm3, %v166_v9 }
 0x1b5   :  { %260 = vst.msk [vmem:[#allocation7 + $0x20] sm:$0xff] %vm53_vm3, %v255_v10  ;;  %v249_v11 = vpop.f32.mrf.mxu3 }
 0x1b6   :  { %v250_v12 = vadd.f32 %v249_v11, %v114_v60 }
 0x1b7   :  { %v246_v13 = vpop.f32.mrf.mxu1 }
 0x1b8   :  { %v257_v14 = vmax.f32 %v250_v12, 0.0  ;;  %v247_v15 = vadd.f32 %v246_v13, %v109_v62 }
 0x1ba   :  { %262 = vst.msk [vmem:[#allocation7 + $0x30] sm:$0xff] %vm53_vm3, %v257_v14  ;;  %v256_v16 = vmax.f32 %v247_v15, 0.0 }
 0x1bc   :  { %261 = vst.msk [vmem:[#allocation7 + $0x28] sm:$0xff] %vm53_vm3, %v256_v16 }
 0x1bd   :  { %v252_v17 = vpop.f32.mrf.mxu3 }
 0x1be   :  { %v253_v18 = vadd.f32 %v252_v17, %v119_v4 }
 0x1c0   :  { %v258_v19 = vmax.f32 %v253_v18, 0.0 }
 0x1c2   :  { %263 = vst.msk [vmem:[#allocation7 + $0x38] sm:$0xff] %vm53_vm3, %v258_v19 }
 0x1c3   :  { %276 = dma.vmem_to_hbm [thread:$0]  %s269_s14, 1024, %s271_s17, [#allocation6], %s392_s18, %s392_s18, %s393_s19  }
 0x1c4   :  { %376 = dma.done.wait [#allocation6], 1024  }
 0x1c5   :  { %377 = vsyncadd [#allocation6], 4294966272 }
 0x1c6   :  { %281 = vsyncpa [#allocation5], 1 }
 0x1c7   :  { %282 = vsyncpa [#allocation6], 1 }

</bundles_post_ra>
